<compile_context>
chip_gen: v7x
topology: tpu7x:2x2x1
jax: 0.10.0
libtpu: 0.0.40
codegen_flags: <defaults>
</compile_context>

<pallas_src>
import jax
import jax.numpy as jnp
from jax.experimental import pallas as pl
from jax.experimental.pallas import tpu as pltpu

_LANES = 128
_MIB = 1024 * 1024


def _device_kind() -> str:
    try:
        return jax.devices()[0].device_kind.lower()
    except Exception:
        return ""


def _softclip_kernel(x_ref, o_ref, *, inv_bound: float):
    # Upcast to f32 (free under the HBM roofline; no-op for f32 inputs) so the
    # denominator isn't rounded in bf16, then cast back on the store.
    x = x_ref[...].astype(jnp.float32)
    # Single divide per element: x / (1 + |x| * (1/bound)) == x / (1 + |x/bound|).
    o_ref[...] = (x / (1.0 + jnp.abs(x) * inv_bound)).astype(o_ref.dtype)


def softclip(x: jax.Array, bound: float = 1.0, *, block_rows: int | None = None) -> jax.Array:
    orig_shape = x.shape
    dtype = x.dtype
    n = x.size
    if n == 0:
        return x

    # TODO(synk): if `bound` ever varies at runtime, pass 1/bound as an SMEM
    # scalar instead of baking it into the trace (avoids per-bound recompiles).
    inv_bound = 1.0 / float(bound)

    itemsize = jnp.dtype(dtype).itemsize
    # Sublane multiple for the block's second-to-last dim: 8 (f32), 16 (bf16), 32 (i8).
    sublanes = max(8, 32 // max(itemsize, 1))

    flat = jnp.ravel(x)
    rows = n // _LANES                 # lane-aligned bulk rows (arbitrary count, no padding)
    tail = n - rows * _LANES           # < 128 ragged elements

    def _jnp_softclip(v):
        vf = v.astype(jnp.float32)
        return (vf / (1.0 + jnp.abs(vf) * inv_bound)).astype(dtype)

    if rows == 0:
        # Fewer than 128 elements: plain jnp, fuses into surrounding ops.
        return _jnp_softclip(flat).reshape(orig_shape)

    bulk = flat[: rows * _LANES].reshape(rows, _LANES)

    # --- generation-aware block sizing ---------------------------------------
    kind = _device_kind()
    multi_core = ("v7" in kind) or ("7x" in kind)     # v7x: 2 TensorCores/chip
    if block_rows is None:
        if "v5" in kind:
            block_rows = 4096      # 2 MiB f32 per buffer -> ~8 MiB pipeline (16 MiB-safe)
        else:
            block_rows = 8192      # v6e / v7x / unknown: 4 MiB f32 per buffer

    br = min(int(block_rows), rows)
    if br < rows:
        # Tiled path: block rows must be a sublane multiple (partial trailing
        # block over the arbitrary `rows` extent is masked by Pallas).
        br = max(sublanes, (br // sublanes) * sublanes)

    if multi_core:
        # Aim for >= 2 blocks per TensorCore (>= 4 total) so both cores get work
        # *and* keep DMA/compute overlap, but never shrink blocks below ~0.5 MiB.
        min_rows = max(sublanes, (512 * 1024) // (_LANES * itemsize))
        while pl.cdiv(rows, br) < 4:
            half = ((br // 2) // sublanes) * sublanes
            if half < min_rows:
                break
            br = half

    grid = (pl.cdiv(rows, br),)
    block_bytes = br * _LANES * itemsize
    # Cover in+out double buffering with headroom; 48 MiB stays under v7x's
    # 64 MiB physical VMEM (v5e/v6e have 128 MiB physical).
    vmem_limit = min(max(6 * block_bytes, 16 * _MIB), 48 * _MIB)

    out_bulk = pl.pallas_call(
        lambda x_ref, o_ref: _softclip_kernel(x_ref, o_ref, inv_bound=inv_bound),
        out_shape=jax.ShapeDtypeStruct((rows, _LANES), dtype),
        grid=grid,
        in_specs=[pl.BlockSpec((br, _LANES), lambda i: (i, 0))],
        out_specs=pl.BlockSpec((br, _LANES), lambda i: (i, 0)),
        compiler_params=pltpu.CompilerParams(
            dimension_semantics=("parallel",),
            vmem_limit_bytes=vmem_limit,
        ),
    )(bulk)

    if tail:
        # Ragged remainder handled with plain jnp (no full-array pad/slice pass).
        tail_y = _jnp_softclip(flat[rows * _LANES:])
        return jnp.concatenate([out_bulk.reshape(-1), tail_y]).reshape(orig_shape)
    return out_bulk.reshape(orig_shape)


if __name__ == "__main__":
    key = jax.random.PRNGKey(0)

    # Case 1: NCHW conv-style input, element count a multiple of 128 (zero-copy path).
    x1 = jax.random.normal(key, (2, 4, 16, 16), dtype=jnp.float32) * 3.0
    bound1 = 1.0
    y1 = jax.block_until_ready(softclip(x1, bound=bound1))
    ref1 = x1 / (1.0 + jnp.abs(x1 / bound1))
    assert y1.shape == x1.shape and y1.dtype == x1.dtype
    assert jnp.allclose(y1, ref1, atol=1e-6, rtol=1e-6)

    # Case 2: ragged element count (exercises the partial trailing block + jnp tail)
    # with bound != 1.
    key2 = jax.random.PRNGKey(0)
    x2 = jax.random.normal(key2, (3, 5, 7, 11), dtype=jnp.float32) * 2.0
    bound2 = 2.5
    y2 = jax.block_until_ready(softclip(x2, bound=bound2))
    ref2 = x2 / (1.0 + jnp.abs(x2 / bound2))
    assert y2.shape == x2.shape and y2.dtype == x2.dtype
    assert jnp.allclose(y2, ref2, atol=1e-6, rtol=1e-5)

    # Case 3: bf16 input (exercises the in-kernel f32 upcast path).
    key3 = jax.random.PRNGKey(0)
    x3 = (jax.random.normal(key3, (4, 64, 8), dtype=jnp.float32) * 2.0).astype(jnp.bfloat16)
    bound3 = 0.5
    y3 = jax.block_until_ready(softclip(x3, bound=bound3))
    x3f = x3.astype(jnp.float32)
    ref3 = (x3f / (1.0 + jnp.abs(x3f / bound3))).astype(jnp.bfloat16)
    assert y3.shape == x3.shape and y3.dtype == x3.dtype
    assert jnp.allclose(y3.astype(jnp.float32), ref3.astype(jnp.float32), atol=1e-2, rtol=2e-2)

    print("KERNEL_OK")
</pallas_src>

<mosaic_0001>
module attributes {stable_mosaic.version = 11 : i64} {
  func.func @_lambda_(%arg0: i32, %arg1: memref<16x128xf32, #tpu.memory_space<vmem>>, %arg2: memref<16x128xf32, #tpu.memory_space<vmem>>) attributes {dimension_semantics = [#tpu.dimension_semantics<parallel>], iteration_bounds = array<i64: 1>, scalar_prefetch = 0 : i64, scratch_operands = 0 : i64, tpu.core_type = #tpu.core_type<tc>, window_params = [{transform_indices = @transform_0, window_bounds = array<i64: 16, 128>}, {transform_indices = @transform_1, window_bounds = array<i64: 16, 128>}]} {
    %c0 = arith.constant 0 : index
    %c0_0 = arith.constant 0 : index
    %0 = vector.load %arg1[%c0, %c0_0] : memref<16x128xf32, #tpu.memory_space<vmem>>, vector<16x128xf32>
    %1 = math.absf %0 : vector<16x128xf32>
    %cst = arith.constant 1.000000e+00 : f32
    %2 = vector.broadcast %cst : f32 to vector<16x128xf32>
    %3 = arith.mulf %1, %2 : vector<16x128xf32>
    %cst_1 = arith.constant 1.000000e+00 : f32
    %4 = vector.broadcast %cst_1 : f32 to vector<16x128xf32>
    %5 = arith.addf %4, %3 : vector<16x128xf32>
    %6 = arith.divf %0, %5 : vector<16x128xf32>
    %c0_2 = arith.constant 0 : index
    %c0_3 = arith.constant 0 : index
    %7 = vector.load %arg2[%c0_2, %c0_3] : memref<16x128xf32, #tpu.memory_space<vmem>>, vector<16x128xf32>
    tpu.vector_store %arg2[%c0_2, %c0_3], %6 {strides = array<i32>} : memref<16x128xf32, #tpu.memory_space<vmem>>, vector<16x128xf32>,
    return
  }
  func.func @transform_0(%arg0: i32) -> (i32, i32) {
    %c0_i32 = arith.constant 0 : i32
    %c0_i32_0 = arith.constant 0 : i32
    return %arg0, %c0_i32 : i32, i32
  }
  func.func @transform_1(%arg0: i32) -> (i32, i32) {
    %c0_i32 = arith.constant 0 : i32
    %c0_i32_0 = arith.constant 0 : i32
    return %arg0, %c0_i32 : i32, i32
  }
}

</mosaic_0001>

<bundles_post_ra>
// kernel: tpu_custom_call.1
= control target key start
LH: loop header
LB: loop body
LE: loop exit
PB: predicated region body
PF: predicated region fallthrough
CT: control target
= control target key end

     0   :  { %6 = vsyncpa [#allocation3], 0  ;;  %s152_s0 = inlined_call_operand.hbm [shape: f32[16,128], index: 0, kind: input, shape index: {}]   ;;  %s153_s1 = inlined_call_operand.hbm [shape: f32[16,128], index: 1, kind: output, shape index: {}]  }
   0x1   :  { %7 = vsyncpa [#allocation4], 0  ;;  %s108_s6 = smov [#allocation2]   ;;  %s60_s10 = scalar_lea.hbm %s152_s0, 256 }
   0x2   :  { %s13_s7 = sshll.u32 %s108_s6, 4  ;;  %p61_p0 = scmp.ne.s32.totalorder %s152_s0, %s60_s10  ;;  %s14_s7 = int_to_ptr.vmem [resolvable:$true] %s13_s7 }
   0x3   :  { %p64_p1 = scmp.lt.u32.totalorder %s60_s10, %s152_s0 }
   0x5   :  { %p66_p2 = pnand %p64_p1, %p61_p0 }
   0x7   :  { %69 = shalt.err (!%p66_p2)
}
   0x8   :  { %s70_s15 = scalar_lea.vmem %s14_s7, 256  ;;  %p75_p4 = scmp.lt.s32.totalorder %s14_s7, %s14_s7 }
   0x9   :  { %p71_p3 = scmp.ne.s32.totalorder %s14_s7, %s70_s15  ;;  %p76_p5 = scmp.lt.s32.totalorder %s70_s15, %s70_s15 }
   0xb   :  { %p77_p6 = por %p76_p5, %p75_p4 }
   0xd   :  { %p78_p7 = pnand %p77_p6, %p71_p3 }
   0xf   :  { %81 = shalt.err (!%p78_p7)
}
  0x10   :  { %s109_s16 = smov 128   ;;  %s110_s17 = smov 8  }
  0x11   :  { %19 = dma.hbm_to_vmem [thread:$0]  %s152_s0, 256, %s14_s7, [#allocation3], %s109_s16, %s109_s16, %s110_s17  }
  0x12   :  { %104 = dma.done.wait [#allocation3], 256  }
  0x13   :  { %105 = vsyncadd [#allocation3], 4294967040  ;;  %v23_v0 = vld [vmem:[#allocation2] sm:$0xff]  ;;  %v24_v1 = vld [vmem:[#allocation2 + $0x8] sm:$0xff]  ;;  %s111_s20 = smov [#allocation5]  }
  0x14   :  { %v25_v2 = vand.u32 2147483647, %v23_v0  ;;  %v26_v3 = vand.u32 2147483647, %v24_v1  ;;  %s40_s21 = sshll.u32 %s111_s20, 4  ;;  %s41_s21 = int_to_ptr.vmem [resolvable:$true] %s40_s21 }
  0x15   :  { %s82_s0 = scalar_lea.vmem %s41_s21, 256  ;;  %p87_p9 = scmp.lt.s32.totalorder %s41_s21, %s41_s21 }
  0x16   :  { %v27_v4 = vadd.f32 1.0, %v25_v2  ;;  %v28_v5 = vadd.f32 1.0, %v26_v3  ;;  %p83_p8 = scmp.ne.s32.totalorder %s41_s21, %s82_s0  ;;  %p88_p10 = scmp.lt.s32.totalorder %s82_s0, %s82_s0 }
  0x18   :  { %56 = vrcp.f32 %v27_v4  ;;  %p89_p11 = por %p88_p10, %p87_p9 }
  0x19   :  { %58 = vrcp.f32 %v28_v5 }
  0x1a   :  { %p90_p12 = pnand %p89_p11, %p83_p8 }
  0x22   :  { %v57_v6 = vpop.eup %56 }
  0x23   :  { %v59_v7 = vpop.eup %58  ;;  %v30_v8 = vmul.f32 %v57_v6, %v23_v0 }
  0x24   :  { %v32_v9 = vmul.f32 %v59_v7, %v24_v1 }
  0x25   :  { %33 = vst [vmem:[#allocation5] sm:$0xff] %v30_v8 }
  0x26   :  { %34 = vst [vmem:[#allocation5 + $0x8] sm:$0xff] %v32_v9 }
  0x27   :  { %93 = shalt.err (!%p90_p12)
}
  0x28   :  { %s94_s24 = scalar_lea.hbm %s153_s1, 256 }
  0x29   :  { %p95_p13 = scmp.ne.s32.totalorder %s153_s1, %s94_s24  ;;  %p98_p0 = scmp.lt.u32.totalorder %s94_s24, %s153_s1 }
  0x2b   :  { %p100_p1 = pnand %p98_p0, %p95_p13 }
  0x2d   :  { %103 = shalt.err (!%p100_p1)
}
  0x2e   :  { %46 = dma.vmem_to_hbm [thread:$0]  %s41_s21, 256, %s153_s1, [#allocation4], %s109_s16, %s109_s16, %s110_s17  }
  0x2f   :  { %106 = dma.done.wait [#allocation4], 256  }
  0x30   :  { %107 = vsyncadd [#allocation4], 4294967040 }
  0x31   :  { %50 = vsyncpa [#allocation3], 1 }
  0x32   :  { %51 = vsyncpa [#allocation4], 1 }

</bundles_post_ra>
